<compile_context>
chip_gen: v5e
topology: v5e:2x2
jax: 0.10.0
libtpu: 0.0.40
codegen_flags: <defaults>
</compile_context>

<pallas_src>
import jax
import jax.numpy as jnp
from jax.experimental import pallas as pl
from jax.experimental.pallas import tpu as pltpu


def sparse_embed_kernel(x_ref, e_ref, o_ref, acc_ref, cnt_ref):
    """One (batch-tile, vocab-tile) step: masked matmul + nonzero-count reduce."""
    k = pl.program_id(1)

    @pl.when(k == 0)
    def _():
        acc_ref[...] = jnp.zeros_like(acc_ref)
        cnt_ref[...] = jnp.zeros_like(cnt_ref)

    nz = x_ref[...] != 0.0                                       # (tb, tv) bool
    # Exact f32 count (VPU/XLU), bf16 0/1 mask to drive the MXU (exact in bf16).
    cnt_ref[...] += jnp.sum(nz.astype(jnp.float32), axis=1, keepdims=True)
    acc_ref[...] += jnp.dot(nz.astype(jnp.bfloat16), e_ref[...],
                            preferred_element_type=jnp.float32)  # (tb, D) f32

    @pl.when(k == pl.num_programs(1) - 1)
    def _():
        inv = pl.reciprocal(cnt_ref[...] + 1e-6, approx=True)    # EUP
        o_ref[...] = (acc_ref[...] * inv).astype(o_ref.dtype)


def _pick_tiles(B, V, D, *, vmem_budget=36 * 1024 * 1024):
    """Choose (tb, tv) to fill the MXU and stay inside a conservative VMEM budget."""
    # Batch tile: largest of these that divides B (>=128 fills MXU rows).
    tb = B
    for cand in (512, 256, 128, 64, 32, 16, 8):
        if cand <= B and B % cand == 0:
            tb = cand
            break

    def footprint(tv):
        x_buf = 2 * tb * tv * 4          # f32 x tiles, double buffered
        e_buf = 2 * tv * D * 2           # bf16 E tiles, double buffered
        o_buf = 2 * tb * D * 4           # f32 out tiles, double buffered
        scratch = tb * D * 4 + tb * 128 * 4  # accumulators (count padded to a lane)
        return x_buf + e_buf + o_buf + scratch

    # Prefer keeping the whole table resident (single k step, E DMA'd once).
    if footprint(V) <= vmem_budget:
        return tb, V
    # Otherwise the largest vocab tile that divides V and fits the budget.
    for cand in (4096, 2048, 1024, 512, 256, 128):
        if cand <= V and V % cand == 0 and footprint(cand) <= vmem_budget:
            return tb, cand
    return tb, 128  # last resort (assumes V % 128 == 0)


def sparse_embed_1d(x, embeddings, *, tb=None, tv=None):
    """x: (B, V) float32; embeddings: (V, D) float32 -> (B, D) float32."""
    B, V = x.shape
    Ve, D = embeddings.shape
    assert V == Ve

    tb_auto, tv_auto = _pick_tiles(B, V, D)
    tb = tb_auto if tb is None else tb
    tv = tv_auto if tv is None else tv
    assert B % tb == 0 and V % tv == 0

    # bf16 table: halves HBM traffic + VMEM footprint for E; MXU accumulates f32.
    e_bf16 = embeddings.astype(jnp.bfloat16)

    table_resident = (tv == V)
    # Constant block index when resident -> Pallas fetches E exactly once.
    e_index_map = (lambda i, k: (0, 0)) if table_resident else (lambda i, k: (k, 0))

    grid = (B // tb, V // tv)

    return pl.pallas_call(
        sparse_embed_kernel,
        out_shape=jax.ShapeDtypeStruct((B, D), jnp.float32),
        grid_spec=pltpu.PrefetchScalarGridSpec(
            num_scalar_prefetch=0,
            grid=grid,
            in_specs=[
                pl.BlockSpec((tb, tv), lambda i, k: (i, k)),   # x tile
                pl.BlockSpec((tv, D), e_index_map),            # embedding tile (bf16)
            ],
            out_specs=pl.BlockSpec((tb, D), lambda i, k: (i, 0)),
            scratch_shapes=[
                pltpu.VMEM((tb, D), jnp.float32),   # embed_sum accumulator
                pltpu.VMEM((tb, 1), jnp.float32),   # nonzero count accumulator
            ],
        ),
        compiler_params=pltpu.CompilerParams(
            dimension_semantics=("parallel", "arbitrary"),
            vmem_limit_bytes=48 * 1024 * 1024,   # safe on v5e/v6e (128 MiB) and v7x (64 MiB)
        ),
    )(x, e_bf16)


if __name__ == "__main__":
    # Small shapes consistent with the module: batch=16, input_size=512, embed=256.
    B, V, D = 16, 512, 256

    key = jax.random.PRNGKey(0)
    k_emb, k_mask, k_val = jax.random.split(key, 3)

    # Synthetic "nn.Embedding" weight (~N(0,1), like torch's default init).
    embeddings = jax.random.normal(k_emb, (V, D), dtype=jnp.float32)

    # Sparse input: ~10% nonzero, with arbitrary nonzero values.
    keep = jax.random.uniform(k_mask, (B, V)) < 0.10
    vals = jax.random.normal(k_val, (B, V), dtype=jnp.float32)
    x = jnp.where(keep, vals, 0.0).astype(jnp.float32)

    out = sparse_embed_1d(x, embeddings)
    out = jax.block_until_ready(out)

    # Pure-JAX f32 reference for the same semantics.
    mask = (x != 0.0).astype(jnp.float32)
    ref = (mask @ embeddings) / (mask.sum(axis=1, keepdims=True) + 1e-6)

    assert out.shape == (B, D)
    # bf16 MXU inputs + approx reciprocal => ~1e-3 relative error budget.
    assert jnp.allclose(out, ref, atol=1e-2, rtol=1e-2)
    print("KERNEL_OK")
</pallas_src>

<mosaic_0001>
module attributes {stable_mosaic.version = 11 : i64} {
  func.func @sparse_embed_kernel(%arg0: i32, %arg1: i32, %arg2: memref<16x512xf32, #tpu.memory_space<vmem>>, %arg3: memref<512x256xbf16, #tpu.memory_space<vmem>>, %arg4: memref<16x256xf32, #tpu.memory_space<vmem>>, %arg5: memref<16x256xf32, #tpu.memory_space<vmem>>, %arg6: memref<16x1xf32, #tpu.memory_space<vmem>>) attributes {dimension_semantics = [#tpu.dimension_semantics<parallel>, #tpu.dimension_semantics<arbitrary>], iteration_bounds = array<i64: 1, 1>, scalar_prefetch = 0 : i64, scratch_operands = 2 : i64, tpu.core_type = #tpu.core_type<tc>, window_params = [{transform_indices = @transform_0, window_bounds = array<i64: 16, 512>}, {pipeline_mode = #tpu.pipeline_mode<synchronous>, transform_indices = @transform_1, window_bounds = array<i64: 512, 256>}, {transform_indices = @transform_2, window_bounds = array<i64: 16, 256>}]} {
    %c0_i32 = arith.constant 0 : i32
    %0 = arith.cmpi eq, %arg1, %c0_i32 : i32
    %1 = arith.extui %0 : i1 to i32
    %c0_i32_0 = arith.constant 0 : i32
    %2 = arith.cmpi ne, %1, %c0_i32_0 : i32
    scf.if %2 {
      %cst_16 = arith.constant 0.000000e+00 : f32
      %24 = vector.broadcast %cst_16 : f32 to vector<16x256xf32>
      %c0_17 = arith.constant 0 : index
      %c0_18 = arith.constant 0 : index
      %25 = vector.load %arg5[%c0_17, %c0_18] : memref<16x256xf32, #tpu.memory_space<vmem>>, vector<16x256xf32>
      tpu.vector_store %arg5[%c0_17, %c0_18], %24 {strides = array<i32>} : memref<16x256xf32, #tpu.memory_space<vmem>>, vector<16x256xf32>,
      %cst_19 = arith.constant 0.000000e+00 : f32
      %26 = vector.broadcast %cst_19 : f32 to vector<16x1xf32>
      %c0_20 = arith.constant 0 : index
      %c0_21 = arith.constant 0 : index
      %27 = vector.load %arg6[%c0_20, %c0_21] : memref<16x1xf32, #tpu.memory_space<vmem>>, vector<16x1xf32>
      tpu.vector_store %arg6[%c0_20, %c0_21], %26 {strides = array<i32>} : memref<16x1xf32, #tpu.memory_space<vmem>>, vector<16x1xf32>,
    } else {
    }
    %c0 = arith.constant 0 : index
    %c0_1 = arith.constant 0 : index
    %3 = vector.load %arg2[%c0, %c0_1] : memref<16x512xf32, #tpu.memory_space<vmem>>, vector<16x512xf32>
    %cst = arith.constant 0.000000e+00 : f32
    %4 = vector.broadcast %cst : f32 to vector<16x512xf32>
    %5 = arith.cmpf one, %3, %4 : vector<16x512xf32>
    %c0_2 = arith.constant 0 : index
    %c0_3 = arith.constant 0 : index
    %6 = vector.load %arg6[%c0_2, %c0_3] : memref<16x1xf32, #tpu.memory_space<vmem>>, vector<16x1xf32>
    %7 = arith.extui %5 : vector<16x512xi1> to vector<16x512xi32>
    %8 = arith.sitofp %7 : vector<16x512xi32> to vector<16x512xf32>
    %cst_4 = arith.constant dense<0.000000e+00> : vector<16xf32>
    %9 = vector.multi_reduction <add>, %8, %cst_4 [1] : vector<16x512xf32> to vector<16xf32>
    %10 = vector.shape_cast %9 : vector<16xf32> to vector<16x1xf32>
    %11 = arith.addf %6, %10 : vector<16x1xf32>
    %c0_5 = arith.constant 0 : index
    %c0_6 = arith.constant 0 : index
    %12 = vector.load %arg6[%c0_5, %c0_6] : memref<16x1xf32, #tpu.memory_space<vmem>>, vector<16x1xf32>
    tpu.vector_store %arg6[%c0_5, %c0_6], %11 {strides = array<i32>} : memref<16x1xf32, #tpu.memory_space<vmem>>, vector<16x1xf32>,
    %c0_7 = arith.constant 0 : index
    %c0_8 = arith.constant 0 : index
    %13 = vector.load %arg5[%c0_7, %c0_8] : memref<16x256xf32, #tpu.memory_space<vmem>>, vector<16x256xf32>
    %14 = arith.extui %5 : vector<16x512xi1> to vector<16x512xi32>
    %15 = arith.sitofp %14 : vector<16x512xi32> to vector<16x512xf32>
    %16 = arith.truncf %15 : vector<16x512xf32> to vector<16x512xbf16>
    %c0_9 = arith.constant 0 : index
    %c0_10 = arith.constant 0 : index
    %17 = vector.load %arg3[%c0_9, %c0_10] : memref<512x256xbf16, #tpu.memory_space<vmem>>, vector<512x256xbf16>
    %cst_11 = arith.constant dense<0.000000e+00> : vector<16x256xf32>
    %18 = tpu.matmul %16, %17, %cst_11 {dimension_numbers = #tpu.dot_dimension_numbers<[1], [0], [0], [1], [0, 0, 1, 1], [], []>} : vector<16x512xbf16>, vector<512x256xbf16>, vector<16x256xf32> -> vector<16x256xf32>
    %19 = arith.addf %13, %18 : vector<16x256xf32>
    %c0_12 = arith.constant 0 : index
    %c0_13 = arith.constant 0 : index
    %20 = vector.load %arg5[%c0_12, %c0_13] : memref<16x256xf32, #tpu.memory_space<vmem>>, vector<16x256xf32>
    tpu.vector_store %arg5[%c0_12, %c0_13], %19 {strides = array<i32>} : memref<16x256xf32, #tpu.memory_space<vmem>>, vector<16x256xf32>,
    %c0_i32_14 = arith.constant 0 : i32
    %21 = arith.cmpi eq, %arg1, %c0_i32_14 : i32
    %22 = arith.extui %21 : i1 to i32
    %c0_i32_15 = arith.constant 0 : i32
    %23 = arith.cmpi ne, %22, %c0_i32_15 : i32
    scf.if %23 {
      %c0_16 = arith.constant 0 : index
      %c0_17 = arith.constant 0 : index
      %24 = vector.load %arg6[%c0_16, %c0_17] : memref<16x1xf32, #tpu.memory_space<vmem>>, vector<16x1xf32>
      %cst_18 = arith.constant 9.99999997E-7 : f32
      %25 = vector.broadcast %cst_18 : f32 to vector<16x1xf32>
      %26 = arith.addf %24, %25 : vector<16x1xf32>
      %27 = tpu.reciprocal %26 {approx = true} : vector<16x1xf32> -> vector<16x1xf32>
      %c0_19 = arith.constant 0 : index
      %c0_20 = arith.constant 0 : index
      %28 = vector.load %arg5[%c0_19, %c0_20] : memref<16x256xf32, #tpu.memory_space<vmem>>, vector<16x256xf32>
      %29 = vector.broadcast %27 : vector<16x1xf32> to vector<16x256xf32>
      %30 = arith.mulf %28, %29 : vector<16x256xf32>
      %c0_21 = arith.constant 0 : index
      %c0_22 = arith.constant 0 : index
      %31 = vector.load %arg4[%c0_21, %c0_22] : memref<16x256xf32, #tpu.memory_space<vmem>>, vector<16x256xf32>
      tpu.vector_store %arg4[%c0_21, %c0_22], %30 {strides = array<i32>} : memref<16x256xf32, #tpu.memory_space<vmem>>, vector<16x256xf32>,
    } else {
    }
    return
  }
  func.func @transform_0(%arg0: i32, %arg1: i32) -> (i32, i32) {
    %c0_i32 = arith.constant 0 : i32
    return %arg0, %arg1 : i32, i32
  }
  func.func @transform_1(%arg0: i32, %arg1: i32) -> (i32, i32) {
    %c0_i32 = arith.constant 0 : i32
    %c0_i32_0 = arith.constant 0 : i32
    %c0_i32_1 = arith.constant 0 : i32
    return %c0_i32, %c0_i32_0 : i32, i32
  }
  func.func @transform_2(%arg0: i32, %arg1: i32) -> (i32, i32) {
    %c0_i32 = arith.constant 0 : i32
    %c0_i32_0 = arith.constant 0 : i32
    return %arg0, %c0_i32 : i32, i32
  }
}

</mosaic_0001>

<bundles_post_ra>
// kernel: tpu_custom_call.1
= control target key start
LH: loop header
LB: loop body
LE: loop exit
PB: predicated region body
PF: predicated region fallthrough
CT: control target
= control target key end

     0   :  { %7 = vsyncpa [#allocation5], 0  ;;  %s1253_s0 = inlined_call_operand.hbm [shape: f32[16,512], index: 0, kind: input, shape index: {}]   ;;  %s1254_s1 = inlined_call_operand.hbm [shape: bf16[512,256], index: 1, kind: input, shape index: {}]   ;;  %s1255_s2 = inlined_call_operand.hbm [shape: f32[16,256], index: 2, kind: output, shape index: {}]  }
   0x1   :  { %8 = vsyncpa [#allocation8], 0 }
   0x2   :  { %9 = vsyncpa [#allocation6], 0  ;;  %s14_s11 = sshll.u32 %s1253_s0, 4  ;;  %s1107_s12 = smov [#allocation4]   ;;  %s15_s11 = int_to_ptr.hbm [resolvable:$true] %s14_s11 }
   0x3   :  { %s16_s13 = sshll.u32 %s1107_s12, 4  ;;  %s27_s16 = sshll.u32 %s1254_s1, 4  ;;  %s17_s13 = int_to_ptr.vmem [resolvable:$true] %s16_s13  ;;  %s28_s16 = int_to_ptr.hbm [resolvable:$true] %s27_s16 }
   0x4   :  { %s1108_s17 = smov 512   ;;  %s1109_s18 = smov 32  }
   0x5   :  { %22 = dma.hbm_to_vmem [thread:$0]  %s15_s11, 1024, %s17_s13, [#allocation5], %s1108_s17, %s1108_s17, %s1109_s18  }
   0x6   :  { %s1110_s19 = smov [#allocation7]   ;;  %s1111_s21 = smov 128  }
   0x7   :  { %s29_s20 = sshll.u32 %s1110_s19, 4  ;;  %s1112_s22 = smov 8   ;;  %s30_s20 = int_to_ptr.vmem [resolvable:$true] %s29_s20 }
   0x8   :  { %35 = dma.hbm_to_vmem [thread:$0]  %s28_s16, 8192, %s30_s20, [#allocation8], %s1111_s21, %s1111_s21, %s1112_s22  }
   0x9   :  { %1101 = dma.done.wait [#allocation5], 1024  }
   0xa   :  { %1102 = vsyncadd [#allocation5], 4294966272 }
   0xb   :  { %1103 = dma.done.wait [#allocation8], 8192  }
   0xc   :  { %1104 = vsyncadd [#allocation8], 4294959104  ;;  %v1140_v0 = vld [vmem:[#allocation4] sm:$0xff]  ;;  %v1142_v1 = vld [vmem:[#allocation4 + $0x8] sm:$0xff]  ;;  %v1113_v6 = vmov 0.0   ;;  %vm52_vm11 = vcmask 7168  }
   0xd   :  { %v1144_v2 = vld [vmem:[#allocation4 + $0x10] sm:$0xff]  ;;  %v1146_v3 = vld [vmem:[#allocation4 + $0x18] sm:$0xff]  ;;  %vm63_vm0 = vcmp.ne.f32.partialorder %v1140_v0, 0.0  ;;  %vm64_vm1 = vcmp.ne.f32.partialorder %v1142_v1, 0.0  ;;  %v1151_v4 = vld [vmem:[#allocation4 + $0x20] sm:$0xff]  ;;  %53 = vst.msk [vmem:[#allocation3] sm:$0xff] %vm52_vm11, %v1113_v6 }
   0xe   :  { %vm65_vm2 = vcmp.ne.f32.partialorder %v1144_v2, 0.0  ;;  %v1153_v5 = vld [vmem:[#allocation4 + $0x28] sm:$0xff]  ;;  %vm66_vm3 = vcmp.ne.f32.partialorder %v1146_v3, 0.0  ;;  %v667_v7 = vsel %vm63_vm0, 1.0, %v1113_v6  ;;  %v668_v8 = vsel %vm64_vm1, 1.0, %v1113_v6  ;;  %v1165_v10 = vld [vmem:[#allocation4 + $0x30] sm:$0xff] }
   0xf   :  { %v669_v9 = vsel %vm65_vm2, 1.0, %v1113_v6  ;;  %v1167_v11 = vld [vmem:[#allocation4 + $0x38] sm:$0xff]  ;;  %v670_v12 = vsel %vm66_vm3, 1.0, %v1113_v6  ;;  %v89_v13 = vadd.f32 %v668_v8, %v667_v7  ;;  %vm67_vm4 = vcmp.ne.f32.partialorder %v1151_v4, 0.0  ;;  %v861_v14 = vld [vmem:[#allocation7 + $0x170] sm:$0xf] }
  0x10   :  { %vm68_vm5 = vcmp.ne.f32.partialorder %v1153_v5, 0.0  ;;  %vm69_vm6 = vcmp.ne.f32.partialorder %v1165_v10, 0.0  ;;  %vm70_vm7 = vcmp.ne.f32.partialorder %v1167_v11, 0.0  ;;  %v671_v15 = vsel %vm67_vm4, 1.0, %v1113_v6  ;;  %v994_v17 = vld [vmem:[#allocation7 + $0x174] sm:$0xf0]  ;;  %vm1208_vm10 = vmpackc.low %vm67_vm4, %vm63_vm0 }
  0x11   :  { %v672_v16 = vsel %vm68_vm5, 1.0, %v1113_v6  ;;  %v90_v18 = vadd.f32 %v669_v9, %v89_v13  ;;  %v673_v19 = vsel %vm69_vm6, 1.0, %v1113_v6  ;;  %v674_v20 = vsel %vm70_vm7, 1.0, %v1113_v6  ;;  %v925_v22 = vld [vmem:[#allocation7 + $0x1f0] sm:$0xf]  ;;  %vm1192_vm8 = vmpackc.low %vm69_vm6, %vm65_vm2  ;;  %54 = vst.msk [vmem:[#allocation3 + $0x8] sm:$0xff] %vm52_vm11, %v1113_v6 }
  0x12   :  { %v94_v21 = vadd.f32 %v672_v16, %v671_v15  ;;  %v1010_v23 = vld [vmem:[#allocation7 + $0x1f4] sm:$0xf0]  ;;  %v862_v24 = vor.u32 %v994_v17, %v861_v14  ;;  %v733_v26 = vld [vmem:[#allocation7 + $0x70] sm:$0xf]  ;;  %v853_v32 = vld [vmem:[#allocation7 + $0x160] sm:$0xf] }
  0x13   :  { %v926_v25 = vor.u32 %v1010_v23, %v925_v22  ;;  %v962_v27 = vld [vmem:[#allocation7 + $0x74] sm:$0xf0]  ;;  %v797_v28 = vld [vmem:[#allocation7 + $0xf0] sm:$0xf]  ;;  %v91_v29 = vadd.f32 %v670_v12, %v90_v18  ;;  %v992_v33 = vld [vmem:[#allocation7 + $0x164] sm:$0xf0] }
  0x14   :  { %v734_v30 = vor.u32 %v962_v27, %v733_v26  ;;  %v978_v31 = vld [vmem:[#allocation7 + $0xf4] sm:$0xf0]  ;;  %524 = vmatpush.bf16.msra.mxu2 %v862_v24  ;;  %v854_v35 = vor.u32 %v992_v33, %v853_v32  ;;  %v917_v36 = vld [vmem:[#allocation7 + $0x1e0] sm:$0xf]  ;;  %v1008_v37 = vld [vmem:[#allocation7 + $0x1e4] sm:$0xf0]  ;;  %v95_v39 = vadd.f32 %v673_v19, %v94_v21 }
  0x15   :  { %538 = vmatpush.bf16.msra.mxu3 %v926_v25  ;;  %v798_v34 = vor.u32 %v978_v31, %v797_v28  ;;  %v725_v38 = vld [vmem:[#allocation7 + $0x60] sm:$0xf]  ;;  %92 = vadd.xlane.f32.xlu0 %v91_v29  ;;  %v918_v40 = vor.u32 %v1008_v37, %v917_v36  ;;  %v960_v41 = vld [vmem:[#allocation7 + $0x64] sm:$0xf0]  ;;  %v845_v46 = vld [vmem:[#allocation7 + $0x150] sm:$0xf] }
  0x16   :  { %496 = vmatpush.bf16.msra.mxu0 %v734_v30  ;;  %v789_v42 = vld [vmem:[#allocation7 + $0xe0] sm:$0xf]  ;;  %v976_v43 = vld [vmem:[#allocation7 + $0xe4] sm:$0xf0]  ;;  %v726_v44 = vor.u32 %v960_v41, %v725_v38  ;;  %v990_v47 = vld [vmem:[#allocation7 + $0x154] sm:$0xf0]  ;;  %v96_v57 = vadd.f32 %v674_v20, %v95_v39 }
  0x17   :  { %510 = vmatpush.bf16.msra.mxu1 %v798_v34  ;;  %v790_v45 = vor.u32 %v976_v43, %v789_v42  ;;  %v909_v48 = vld [vmem:[#allocation7 + $0x1d0] sm:$0xf]  ;;  %v1006_v49 = vld [vmem:[#allocation7 + $0x1d4] sm:$0xf0]  ;;  %v846_v52 = vor.u32 %v990_v47, %v845_v46  ;;  %v837_v56 = vld [vmem:[#allocation7 + $0x140] sm:$0xf] }
  0x18   :  { %v717_v50 = vld [vmem:[#allocation7 + $0x50] sm:$0xf]  ;;  %v958_v51 = vld [vmem:[#allocation7 + $0x54] sm:$0xf0]  ;;  %525 = vmatpush.bf16.msra.mxu2 %v854_v35  ;;  %v910_v53 = vor.u32 %v1006_v49, %v909_v48  ;;  %v988_v59 = vld [vmem:[#allocation7 + $0x144] sm:$0xf0] }
  0x19   :  { %539 = vmatpush.bf16.msra.mxu3 %v918_v40  ;;  %v781_v54 = vld [vmem:[#allocation7 + $0xd0] sm:$0xf]  ;;  %v974_v55 = vld [vmem:[#allocation7 + $0xd4] sm:$0xf0]  ;;  %v718_v58 = vor.u32 %v958_v51, %v717_v50  ;;  %v901_v60 = vld [vmem:[#allocation7 + $0x1c0] sm:$0xf]  ;;  %v838_v12 = vor.u32 %v988_v59, %v837_v56 }
  0x1a   :  { %497 = vmatpush.bf16.msra.mxu0 %v726_v44  ;;  %v1004_v61 = vld [vmem:[#allocation7 + $0x1c4] sm:$0xf0]  ;;  %v782_v62 = vor.u32 %v974_v55, %v781_v54  ;;  %v709_v63 = vld [vmem:[#allocation7 + $0x40] sm:$0xf]  ;;  %v829_v14 = vld [vmem:[#allocation7 + $0x130] sm:$0xf] }
  0x1b   :  { %511 = vmatpush.bf16.msra.mxu1 %v790_v45  ;;  %v956_v7 = vld [vmem:[#allocation7 + $0x44] sm:$0xf0]  ;;  %v773_v8 = vld [vmem:[#allocation7 + $0xc0] sm:$0xf]  ;;  %v902_v13 = vor.u32 %v1004_v61, %v901_v60  ;;  %v986_v16 = vld [vmem:[#allocation7 + $0x134] sm:$0xf0] }
  0x1c   :  { %v972_v9 = vld [vmem:[#allocation7 + $0xc4] sm:$0xf0]  ;;  %526 = vmatpush.bf16.msra.mxu2 %v846_v52  ;;  %v710_v15 = vor.u32 %v956_v7, %v709_v63  ;;  %v893_v17 = vld [vmem:[#allocation7 + $0x1b0] sm:$0xf]  ;;  %v1002_v18 = vld [vmem:[#allocation7 + $0x1b4] sm:$0xf0]  ;;  %v830_v24 = vor.u32 %v986_v16, %v829_v14 }
  0x1d   :  { %540 = vmatpush.bf16.msra.mxu3 %v910_v53  ;;  %97 = vadd.xlane.f32.xlu0 %v96_v57  ;;  %v774_v19 = vor.u32 %v972_v9, %v773_v8  ;;  %v701_v20 = vld [vmem:[#allocation7 + $0x30] sm:$0xf]  ;;  %v954_v21 = vld [vmem:[#allocation7 + $0x34] sm:$0xf0]  ;;  %v894_v25 = vor.u32 %v1002_v18, %v893_v17  ;;  %v821_v26 = vld [vmem:[#allocation7 + $0x120] sm:$0xf] }
  0x1e   :  { %498 = vmatpush.bf16.msra.mxu0 %v718_v58  ;;  %v765_v22 = vld [vmem:[#allocation7 + $0xb0] sm:$0xf]  ;;  %v970_v23 = vld [vmem:[#allocation7 + $0xb4] sm:$0xf0]  ;;  %v702_v27 = vor.u32 %v954_v21, %v701_v20  ;;  %v984_v28 = vld [vmem:[#allocation7 + $0x124] sm:$0xf0] }
  0x1f   :  { %512 = vmatpush.bf16.msra.mxu1 %v782_v62  ;;  %v885_v29 = vld [vmem:[#allocation7 + $0x1a0] sm:$0xf]  ;;  %v1000_v30 = vld [vmem:[#allocation7 + $0x1a4] sm:$0xf0]  ;;  %v766_v31 = vor.u32 %v970_v23, %v765_v22  ;;  %v822_v36 = vor.u32 %v984_v28, %v821_v26  ;;  %v813_v38 = vld [vmem:[#allocation7 + $0x110] sm:$0xf] }
  0x20   :  { %527 = vmatpush.bf16.msra.mxu2 %v838_v12  ;;  %v693_v32 = vld [vmem:[#allocation7 + $0x20] sm:$0xf]  ;;  %v952_v33 = vld [vmem:[#allocation7 + $0x24] sm:$0xf0]  ;;  %v886_v37 = vor.u32 %v1000_v30, %v885_v29  ;;  %v982_v40 = vld [vmem:[#allocation7 + $0x114] sm:$0xf0] }
  0x21   :  { %541 = vmatpush.bf16.msra.mxu3 %v902_v13  ;;  %v757_v34 = vld [vmem:[#allocation7 + $0xa0] sm:$0xf]  ;;  %v968_v35 = vld [vmem:[#allocation7 + $0xa4] sm:$0xf0]  ;;  %v694_v39 = vor.u32 %v952_v33, %v693_v32  ;;  %v877_v41 = vld [vmem:[#allocation7 + $0x190] sm:$0xf]  ;;  %v814_v49 = vor.u32 %v982_v40, %v813_v38 }
  0x22   :  { %499 = vmatpush.bf16.msra.mxu0 %v710_v15  ;;  %v998_v42 = vld [vmem:[#allocation7 + $0x194] sm:$0xf0]  ;;  %v758_v43 = vor.u32 %v968_v35, %v757_v34  ;;  %v685_v44 = vld [vmem:[#allocation7 + $0x10] sm:$0xf]  ;;  %v805_v48 = vld [vmem:[#allocation7 + $0x100] sm:$0xf] }
  0x23   :  { %513 = vmatpush.bf16.msra.mxu1 %v774_v19  ;;  %v950_v45 = vld [vmem:[#allocation7 + $0x14] sm:$0xf0]  ;;  %v749_v46 = vld [vmem:[#allocation7 + $0x90] sm:$0xf]  ;;  %v878_v50 = vor.u32 %v998_v42, %v877_v41  ;;  %v980_v51 = vld [vmem:[#allocation7 + $0x104] sm:$0xf0] }
  0x24   :  { %528 = vmatpush.bf16.msra.mxu2 %v830_v24  ;;  %v966_v47 = vld [vmem:[#allocation7 + $0x94] sm:$0xf0]  ;;  %v993_v52 = vld [vmem:[#allocation7 + $0x174] sm:$0xf]  ;;  %v863_v53 = vld [vmem:[#allocation7 + $0x178] sm:$0xf0]  ;;  %v686_v54 = vor.u32 %v950_v45, %v685_v44  ;;  %v806_v8 = vor.u32 %v980_v51, %v805_v48 }
  0x25   :  { %542 = vmatpush.bf16.msra.mxu3 %v894_v25  ;;  %v869_v55 = vld [vmem:[#allocation7 + $0x180] sm:$0xf]  ;;  %v996_v56 = vld [vmem:[#allocation7 + $0x184] sm:$0xf0]  ;;  %v1009_v57 = vld [vmem:[#allocation7 + $0x1f4] sm:$0xf]  ;;  %v750_v58 = vor.u32 %v966_v47, %v749_v46  ;;  %v866_v15 = vor.u32 %v993_v52, %v863_v53 }
  0x26   :  { %500 = vmatpush.bf16.msra.mxu0 %v702_v27  ;;  %v927_v59 = vld [vmem:[#allocation7 + $0x1f8] sm:$0xf0]  ;;  %v677_v60 = vld [vmem:[#allocation7] sm:$0xf]  ;;  %v948_v61 = vld [vmem:[#allocation7 + $0x4] sm:$0xf0]  ;;  %v870_v9 = vor.u32 %v996_v56, %v869_v55 }
  0x27   :  { %514 = vmatpush.bf16.msra.mxu1 %v766_v31  ;;  %v741_v62 = vld [vmem:[#allocation7 + $0x80] sm:$0xf]  ;;  %v964_v63 = vld [vmem:[#allocation7 + $0x84] sm:$0xf0]  ;;  %v961_v7 = vld [vmem:[#allocation7 + $0x74] sm:$0xf]  ;;  %v930_v16 = vor.u32 %v1009_v57, %v927_v59  ;;  %v678_v18 = vor.u32 %v948_v61, %v677_v60 }
  0x28   :  { %529 = vmatpush.bf16.msra.mxu2 %v822_v36  ;;  %v735_v12 = vld [vmem:[#allocation7 + $0x78] sm:$0xf0]  ;;  %v977_v13 = vld [vmem:[#allocation7 + $0xf4] sm:$0xf]  ;;  %v991_v17 = vld [vmem:[#allocation7 + $0x164] sm:$0xf]  ;;  %v742_v19 = vor.u32 %v964_v63, %v741_v62 }
  0x29   :  { %543 = vmatpush.bf16.msra.mxu3 %v886_v37  ;;  %v799_v14 = vld [vmem:[#allocation7 + $0xf8] sm:$0xf0]  ;;  %v855_v20 = vld [vmem:[#allocation7 + $0x168] sm:$0xf0]  ;;  %v1007_v21 = vld [vmem:[#allocation7 + $0x1e4] sm:$0xf]  ;;  %v738_v23 = vor.u32 %v961_v7, %v735_v12 }
  0x2a   :  { %501 = vmatpush.bf16.msra.mxu0 %v694_v39  ;;  %v919_v22 = vld [vmem:[#allocation7 + $0x1e8] sm:$0xf0]  ;;  %v802_v24 = vor.u32 %v977_v13, %v799_v14  ;;  %v959_v25 = vld [vmem:[#allocation7 + $0x64] sm:$0xf]  ;;  %v858_v30 = vor.u32 %v991_v17, %v855_v20  ;;  %v989_v32 = vld [vmem:[#allocation7 + $0x154] sm:$0xf] }
  0x2b   :  { %515 = vmatpush.bf16.msra.mxu1 %v758_v43  ;;  %v727_v26 = vld [vmem:[#allocation7 + $0x68] sm:$0xf0]  ;;  %v975_v27 = vld [vmem:[#allocation7 + $0xe4] sm:$0xf]  ;;  %v922_v31 = vor.u32 %v1007_v21, %v919_v22  ;;  %v847_v33 = vld [vmem:[#allocation7 + $0x158] sm:$0xf0] }
  0x2c   :  { %530 = vmatpush.bf16.msra.mxu2 %v814_v49  ;;  %v791_v28 = vld [vmem:[#allocation7 + $0xe8] sm:$0xf0]  ;;  %vm1200_vm9 = vmpackc.low %vm70_vm7, %vm66_vm3  ;;  %v1005_v2 = vld [vmem:[#allocation7 + $0x1d4] sm:$0xf]  ;;  %v730_v3 = vor.u32 %v959_v25, %v727_v26  ;;  %v1114_v39 = vmov 1.0|1.0   ;;  %v850_v1 = vor.u32 %v989_v32, %v847_v33 }
  0x2d   :  { %544 = vmatpush.bf16.msra.mxu3 %v878_v50  ;;  %v911_v10 = vld [vmem:[#allocation7 + $0x1d8] sm:$0xf0]  ;;  %v794_v11 = vor.u32 %v975_v27, %v791_v28  ;;  %v957_v36 = vld [vmem:[#allocation7 + $0x54] sm:$0xf]  ;;  %vm1216_vm12 = vmpackc.low %vm68_vm5, %vm64_vm1  ;;  %s1116_s0 = smov [#allocation9]   ;;  %s653_s25 = sshll.u32 %s1255_s2, 4  ;;  %s654_s25 = int_to_ptr.hbm [resolvable:$true] %s653_s25 }
  0x2e   :  { %502 = vmatpush.bf16.msra.mxu0 %v686_v54  ;;  %v719_v0 = vld [vmem:[#allocation7 + $0x58] sm:$0xf0]  ;;  %v973_v4 = vld [vmem:[#allocation7 + $0xd4] sm:$0xf]  ;;  %v914_v5 = vor.u32 %v1005_v2, %v911_v10  ;;  %v987_v40 = vld [vmem:[#allocation7 + $0x144] sm:$0xf] }
  0x2f   :  { %516 = vmatpush.bf16.msra.mxu1 %v750_v58  ;;  %v783_v38 = vld [vmem:[#allocation7 + $0xd8] sm:$0xf0]  ;;  %v839_v41 = vld [vmem:[#allocation7 + $0x148] sm:$0xf0]  ;;  %v1003_v42 = vld [vmem:[#allocation7 + $0x1c4] sm:$0xf]  ;;  %v722_v44 = vor.u32 %v957_v36, %v719_v0 }
  0x30   :  { %531 = vmatpush.bf16.msra.mxu2 %v806_v8  ;;  %v903_v43 = vld [vmem:[#allocation7 + $0x1c8] sm:$0xf0]  ;;  %v786_v45 = vor.u32 %v973_v4, %v783_v38  ;;  %v955_v46 = vld [vmem:[#allocation7 + $0x44] sm:$0xf]  ;;  %v842_v50 = vor.u32 %v987_v40, %v839_v41  ;;  %v985_v52 = vld [vmem:[#allocation7 + $0x134] sm:$0xf] }
  0x31   :  { %545 = vmatpush.bf16.msra.mxu3 %v870_v9  ;;  %v711_v47 = vld [vmem:[#allocation7 + $0x48] sm:$0xf0]  ;;  %v971_v48 = vld [vmem:[#allocation7 + $0xc4] sm:$0xf]  ;;  %v906_v51 = vor.u32 %v1003_v42, %v903_v43  ;;  %v831_v53 = vld [vmem:[#allocation7 + $0x138] sm:$0xf0] }
  0x32   :  { %503 = vmatpush.bf16.msra.mxu0 %v678_v18  ;;  %v775_v49 = vld [vmem:[#allocation7 + $0xc8] sm:$0xf0]  ;;  %v1001_v54 = vld [vmem:[#allocation7 + $0x1b4] sm:$0xf]  ;;  %v895_v55 = vld [vmem:[#allocation7 + $0x1b8] sm:$0xf0]  ;;  %v714_v56 = vor.u32 %v955_v46, %v711_v47  ;;  %v834_v62 = vor.u32 %v985_v52, %v831_v53 }
  0x33   :  { %517 = vmatpush.bf16.msra.mxu1 %v742_v19  ;;  %936 = vmatmul.msk.bf16.vlgmr.msra.gmra.mxu2 %vm1192_vm8, %v1114_v39  ;;  %v778_v57 = vor.u32 %v971_v48, %v775_v49  ;;  %v953_v58 = vld [vmem:[#allocation7 + $0x34] sm:$0xf]  ;;  %v703_v59 = vld [vmem:[#allocation7 + $0x38] sm:$0xf0]  ;;  %v898_v63 = vor.u32 %v1001_v54, %v895_v55  ;;  %v983_v7 = vld [vmem:[#allocation7 + $0x124] sm:$0xf] }
  0x34   :  { %580 = vmatpush.bf16.msrb.mxu2 %v866_v15  ;;  %938 = vmatmul.msk.bf16.vlgmr.msra.gmra.mxu3 %vm1200_vm9, %v1114_v39  ;;  %v969_v60 = vld [vmem:[#allocation7 + $0xb4] sm:$0xf]  ;;  %v767_v61 = vld [vmem:[#allocation7 + $0xb8] sm:$0xf0]  ;;  %v823_v8 = vld [vmem:[#allocation7 + $0x128] sm:$0xf0]  ;;  %v706_v13 = vor.u32 %v953_v58, %v703_v59 }
  0x35   :  { %594 = vmatpush.bf16.msrb.mxu3 %v930_v16  ;;  %932 = vmatmul.msk.bf16.vlgmr.msra.gmra.mxu0 %vm1208_vm10, %v1114_v39  ;;  %v999_v9 = vld [vmem:[#allocation7 + $0x1a4] sm:$0xf]  ;;  %v887_v12 = vld [vmem:[#allocation7 + $0x1a8] sm:$0xf0]  ;;  %v770_v14 = vor.u32 %v969_v60, %v767_v61  ;;  %v826_v19 = vor.u32 %v983_v7, %v823_v8  ;;  %v981_v20 = vld [vmem:[#allocation7 + $0x114] sm:$0xf] }
  0x36   :  { %552 = vmatpush.bf16.msrb.mxu0 %v738_v23  ;;  %934 = vmatmul.msk.bf16.vlgmr.msra.gmra.mxu1 %vm1216_vm12, %v1114_v39  ;;  %v951_v15 = vld [vmem:[#allocation7 + $0x24] sm:$0xf]  ;;  %v695_v16 = vld [vmem:[#allocation7 + $0x28] sm:$0xf0]  ;;  %v890_v6 = vor.u32 %v999_v9, %v887_v12  ;;  %v815_v21 = vld [vmem:[#allocation7 + $0x118] sm:$0xf0] }
  0x37   :  { %566 = vmatpush.bf16.msrb.mxu1 %v802_v24  ;;  %v967_v17 = vld [vmem:[#allocation7 + $0xa4] sm:$0xf]  ;;  %v759_v18 = vld [vmem:[#allocation7 + $0xa8] sm:$0xf0]  ;;  %v997_v22 = vld [vmem:[#allocation7 + $0x194] sm:$0xf]  ;;  %v698_v24 = vor.u32 %v951_v15, %v695_v16 }
  0x38   :  { %581 = vmatpush.bf16.msrb.mxu2 %v858_v30  ;;  %v879_v23 = vld [vmem:[#allocation7 + $0x198] sm:$0xf0]  ;;  %v762_v25 = vor.u32 %v967_v17, %v759_v18  ;;  %v949_v26 = vld [vmem:[#allocation7 + $0x14] sm:$0xf]  ;;  %v979_v33 = vld [vmem:[#allocation7 + $0x104] sm:$0xf] }
  0x39   :  { %595 = vmatpush.bf16.msrb.mxu3 %v922_v31  ;;  %v687_v27 = vld [vmem:[#allocation7 + $0x18] sm:$0xf0]  ;;  %v965_v28 = vld [vmem:[#allocation7 + $0x94] sm:$0xf]  ;;  %v818_v31 = vor.u32 %v981_v20, %v815_v21  ;;  %v882_v32 = vor.u32 %v997_v22, %v879_v23  ;;  %v807_v2 = vld [vmem:[#allocation7 + $0x108] sm:$0xf0] }
  0x3a   :  { %553 = vmatpush.bf16.msrb.mxu0 %v730_v3  ;;  %v751_v30 = vld [vmem:[#allocation7 + $0x98] sm:$0xf0]  ;;  %v995_v10 = vld [vmem:[#allocation7 + $0x184] sm:$0xf]  ;;  %v871_v3 = vld [vmem:[#allocation7 + $0x188] sm:$0xf0] }
  0x3b   :  { %567 = vmatpush.bf16.msrb.mxu1 %v794_v11  ;;  %v690_v11 = vor.u32 %v949_v26, %v687_v27  ;;  %v754_v36 = vor.u32 %v965_v28, %v751_v30  ;;  %v947_v0 = vld [vmem:[#allocation7 + $0x4] sm:$0xf]  ;;  %v679_v4 = vld [vmem:[#allocation7 + $0x8] sm:$0xf0]  ;;  %v874_v40 = vor.u32 %v995_v10, %v871_v3  ;;  %v1115_v43 = vmov 0   ;;  %v72_v29 = vld [vmem:[#allocation3 + $0x8] sm:$0xff] }
  0x3c   :  { %582 = vmatpush.bf16.msrb.mxu2 %v850_v1  ;;  %v963_v38 = vld [vmem:[#allocation7 + $0x84] sm:$0xf]  ;;  %v743_v1 = vld [vmem:[#allocation7 + $0x88] sm:$0xf0]  ;;  %v682_v41 = vor.u32 %v947_v0, %v679_v4  ;;  %1023 = vset.pattern.permute.xlu1 %v1115_v43  ;;  %s651_s1 = sshll.u32 %s1116_s0, 4  ;;  %s1117_s26 = smov 256   ;;  %s652_s1 = int_to_ptr.vmem [resolvable:$true] %s651_s1 }
  0x3d   :  { %596 = vmatpush.bf16.msrb.mxu3 %v914_v5  ;;  %v810_v5 = vor.u32 %v979_v33, %v807_v2  ;;  %v746_v42 = vor.u32 %v963_v38, %v743_v1  ;;  %1024 = vset.pattern.permute.xlu0 %v1115_v43  ;;  %s1118_s27 = smov 16  }
  0x3e   :  { %554 = vmatpush.bf16.msrb.mxu0 %v722_v44  ;;  %v71_v44 = vld [vmem:[#allocation3] sm:$0xff] }
  0x3f   :  { %568 = vmatpush.bf16.msrb.mxu1 %v786_v45 }
  0x40   :  { %583 = vmatpush.bf16.msrb.mxu2 %v842_v50 }
  0x41   :  { %597 = vmatpush.bf16.msrb.mxu3 %v906_v51 }
  0x42   :  { %555 = vmatpush.bf16.msrb.mxu0 %v714_v56 }
  0x43   :  { %569 = vmatpush.bf16.msrb.mxu1 %v778_v57 }
  0x44   :  { %584 = vmatpush.bf16.msrb.mxu2 %v834_v62 }
  0x45   :  { %598 = vmatpush.bf16.msrb.mxu3 %v898_v63 }
  0x46   :  { %556 = vmatpush.bf16.msrb.mxu0 %v706_v13 }
  0x47   :  { %570 = vmatpush.bf16.msrb.mxu1 %v770_v14 }
  0x48   :  { %585 = vmatpush.bf16.msrb.mxu2 %v826_v19 }
  0x49   :  { %599 = vmatpush.bf16.msrb.mxu3 %v890_v6 }
  0x4a   :  { %557 = vmatpush.bf16.msrb.mxu0 %v698_v24 }
  0x4b   :  { %571 = vmatpush.bf16.msrb.mxu1 %v762_v25 }
  0x4c   :  { %586 = vmatpush.bf16.msrb.mxu2 %v818_v31 }
  0x4d   :  { %600 = vmatpush.bf16.msrb.mxu3 %v882_v32 }
  0x4e   :  { %558 = vmatpush.bf16.msrb.mxu0 %v690_v11 }
  0x4f   :  { %572 = vmatpush.bf16.msrb.mxu1 %v754_v36 }
  0x50   :  { %587 = vmatpush.bf16.msrb.mxu2 %v810_v5 }
  0x51   :  { %601 = vmatpush.bf16.msrb.mxu3 %v874_v40 }
  0x52   :  { %559 = vmatpush.bf16.msrb.mxu0 %v682_v41 }
  0x53   :  { %573 = vmatpush.bf16.msrb.mxu1 %v746_v42  ;;  %944 = vmatmul.msk.bf16.vlgmr.msrb.gmra.mxu2 %vm1192_vm8, %v1114_v39 }
  0x54   :  { %946 = vmatmul.msk.bf16.vlgmr.msrb.gmra.mxu3 %vm1200_vm9, %v1114_v39 }
  0x55   :  { %940 = vmatmul.msk.bf16.vlgmr.msrb.gmra.mxu0 %vm1208_vm10, %v1114_v39 }
  0x56   :  { %942 = vmatmul.msk.bf16.vlgmr.msrb.gmra.mxu1 %vm1216_vm12, %v1114_v39 }
  0x88   :  { %v93_v45 = vpop.xlane.xlu0 %92 }
  0x89   :  { %v99_v46 = vadd.f32 %v93_v45, %v71_v44 }
  0x8b   :  { %102 = vst.msk [vmem:[#allocation3] sm:$0xff] %vm52_vm11, %v99_v46 }
  0x90   :  { %v98_v47 = vpop.xlane.xlu0 %97 }
  0x91   :  { %v100_v34 = vadd.f32 %v98_v47, %v72_v29 }
  0x92   :  { %v619_v48 = vld [vmem:[#allocation3] sm:$0xff] }
  0x93   :  { %103 = vst.msk [vmem:[#allocation3 + $0x8] sm:$0xff] %vm52_vm11, %v100_v34  ;;  %v621_v35 = vadd.f32 1e-06, %v619_v48 }
  0x95   :  { %1025 = vrcp.f32 %v621_v35 }
  0x9a   :  { %v620_v49 = vld [vmem:[#allocation3 + $0x8] sm:$0xff] }
  0x9b   :  { %v1026_v50 = vpop.eup %1025  ;;  %v622_v37 = vadd.f32 1e-06, %v620_v49 }
  0x9c   :  { %631 = vperm.xlu1 %1023, %v1026_v50  }
  0x9d   :  { %1027 = vrcp.f32 %v622_v37 }
  0xa3   :  { %v1028_v39 = vpop.eup %1027 }
  0xa4   :  { %636 = vperm.xlu1 %1023, %v1028_v39  }
  0xb2   :  { %v505_v51 = vpop.f32.mrf.mxu0 }
  0xb3   :  { %v519_v52 = vpop.f32.mrf.mxu1 }
  0xb4   :  { %v520_v63 = vadd.f32 %v519_v52, %v505_v51 }
  0xb6   :  { %v533_v53 = vpop.f32.mrf.mxu2 }
  0xb7   :  { %v547_v54 = vpop.f32.mrf.mxu3  ;;  %v534_v9 = vadd.f32 %v533_v53, %v520_v63 }
  0xb9   :  { %v548_v15 = vadd.f32 %v547_v54, %v534_v9 }
  0xba   :  { %v507_v55 = vpop.f32.mrf.mxu0 }
  0xbb   :  { %v521_v56 = vpop.f32.mrf.mxu1 }
  0xbc   :  { %v522_v16 = vadd.f32 %v521_v56, %v507_v55 }
  0xbe   :  { %v535_v57 = vpop.f32.mrf.mxu2 }
  0xbf   :  { %v549_v58 = vpop.f32.mrf.mxu3  ;;  %v536_v21 = vadd.f32 %v535_v57, %v522_v16 }
  0xc1   :  { %v550_v24 = vadd.f32 %v549_v58, %v536_v21 }
  0xd2   :  { %v561_v59 = vpop.f32.mrf.mxu0 }
  0xd3   :  { %v575_v60 = vpop.f32.mrf.mxu1 }
  0xd4   :  { %v576_v61 = vadd.f32 %v575_v60, %v561_v59 }
  0xd6   :  { %v589_v62 = vpop.f32.mrf.mxu2 }
  0xd7   :  { %v590_v7 = vadd.f32 %v589_v62, %v576_v61  ;;  %v603_v8 = vpop.f32.mrf.mxu3 }
  0xd9   :  { %v604_v14 = vadd.f32 %v603_v8, %v590_v7 }
  0xda   :  { %v563_v12 = vpop.f32.mrf.mxu0 }
  0xdb   :  { %v577_v13 = vpop.f32.mrf.mxu1 }
  0xdc   :  { %v578_v17 = vadd.f32 %v577_v13, %v563_v12 }
  0xde   :  { %v591_v18 = vpop.f32.mrf.mxu2 }
  0xdf   :  { %v592_v22 = vadd.f32 %v591_v18, %v578_v17  ;;  %v605_v23 = vpop.f32.mrf.mxu3 }
  0xe1   :  { %v606_v25 = vadd.f32 %v605_v23, %v592_v22 }
 0x10e   :  { %v632_v19 = vpop.permute.xlu1 %631 }
 0x10f   :  { %v639_v6 = vmul.f32 %v632_v19, %v548_v15  ;;  %v640_v20 = vmul.f32 %v632_v19, %v604_v14 }
 0x111   :  { %643 = vst [vmem:[#allocation9] sm:$0xff] %v639_v6 }
 0x112   :  { %644 = vst [vmem:[#allocation9 + $0x8] sm:$0xff] %v640_v20 }
 0x116   :  { %v637_v26 = vpop.permute.xlu1 %636 }
 0x117   :  { %v641_v27 = vmul.f32 %v637_v26, %v550_v24  ;;  %v642_v28 = vmul.f32 %v637_v26, %v606_v25 }
 0x119   :  { %645 = vst [vmem:[#allocation9 + $0x10] sm:$0xff] %v641_v27 }
 0x11a   :  { %646 = vst [vmem:[#allocation9 + $0x18] sm:$0xff] %v642_v28 }
 0x11b   :  { %659 = dma.vmem_to_hbm [thread:$0]  %s652_s1, 512, %s654_s25, [#allocation6], %s1117_s26, %s1117_s26, %s1118_s27  }
 0x11c   :  { %1105 = dma.done.wait [#allocation6], 512  }
 0x11d   :  { %1106 = vsyncadd [#allocation6], 4294966784 }
 0x11e   :  { %664 = vsyncpa [#allocation5], 1 }
 0x11f   :  { %665 = vsyncpa [#allocation8], 1 }
 0x120   :  { %666 = vsyncpa [#allocation6], 1 }

</bundles_post_ra>
